<compile_context>
chip_gen: v5e
topology: v5e:2x2
jax: 0.10.0
libtpu: 0.0.40
codegen_flags: <defaults>
</compile_context>

<pallas_src>
import functools

import jax
import jax.numpy as jnp
from jax.experimental import pallas as pl
from jax.experimental.pallas import tpu as pltpu


def _layernorm_kernel(x_ref, g_ref, b_ref, o_ref, *, eps, c):
    # x_ref / o_ref: (NB, C, TL)    g_ref / b_ref: (C, 1)
    x = x_ref[...].astype(jnp.float32)                          # (NB, C, TL)
    mean = jnp.mean(x, axis=1, keepdims=True)                   # (NB, 1, TL)
    d = x - mean
    # torch.std default is unbiased (Bessel correction: divide by C-1).
    # NOTE: C == 1 is degenerate (matches torch's NaN behaviour); not guarded.
    var = jnp.sum(d * d, axis=1, keepdims=True) * (1.0 / (c - 1))
    std = jnp.sqrt(var)
    # One reciprocal per lane instead of C divides per lane. approx=False keeps
    # exact-divide semantics; do NOT fold eps into an rsqrt (changes numerics).
    inv = pl.reciprocal(std + eps, approx=False)                # (NB, 1, TL)
    g = g_ref[...].astype(jnp.float32)                          # (C, 1) -> bcast
    b = b_ref[...].astype(jnp.float32)
    o_ref[...] = (g * (d * inv) + b).astype(o_ref.dtype)


def _cdiv(a, b):
    return -(-a // b)


def _round_up(v, m):
    return _cdiv(v, m) * m


def _pick_tiles(n, c, hw, itemsize, *, vmem_tile_budget, target_tile_bytes):
    """Pick (nb, tl): N-block count and lane tile (multiple of 128).

    Sized by bytes-per-step: per element the pipeline holds double-buffered
    input + output tiles (itemsize each) plus ~2 fp32 intermediates (the f32
    upcast and the centered values) live in the body.
    """
    hw_pad = _round_up(hw, 128)
    per_elem_bytes = 4 * itemsize + 2 * 4
    max_tile_elems = max(c * 128, vmem_tile_budget // per_elem_bytes)

    # Lane tile cap from the element budget at nb=1, then balance the lane
    # grid (no divisibility requirement) so the ragged last block is not
    # mostly padding.
    tl_cap = max(128, (max_tile_elems // c) // 128 * 128)
    if tl_cap >= hw_pad:
        tl = hw_pad
    else:
        lane_blocks = _cdiv(hw_pad, tl_cap)
        tl = _round_up(_cdiv(hw_pad, lane_blocks), 128)

    # If a single (1, C, tl) tile moves too few bytes (small C and/or small
    # HW), block over N too so the ~0.35us fixed per-step cost is amortized.
    nb = 1
    tile_bytes = c * tl * itemsize
    if tl >= hw_pad and tile_bytes < target_tile_bytes:
        nb = _cdiv(target_tile_bytes, tile_bytes)
        nb = max(1, min(nb, n, max_tile_elems // (c * tl)))
        # Keep at least 2 grid steps when possible so both v7x TensorCores
        # (parallel grid axes) get work.
        if n >= 2:
            nb = min(nb, _cdiv(n, 2))
    return nb, tl


def layernorm_pallas(x, gamma, beta, eps=1e-6):
    """x: (N, C, H, W); gamma, beta: (1, C, 1, 1). Returns (N, C, H, W)."""
    n, c, h, w = x.shape
    hw = h * w
    itemsize = jnp.dtype(x.dtype).itemsize

    # 48 MiB scoped VMEM: below v7x's 64 MiB physical, well below the 128 MiB
    # of v5e/v6e (whose default scoped limits are lower, hence set explicitly).
    vmem_limit_bytes = 48 * 1024 * 1024
    nb, tl = _pick_tiles(
        n, c, hw, itemsize,
        vmem_tile_budget=(vmem_limit_bytes * 3) // 4,   # leave compiler headroom
        target_tile_bytes=4 * 1024 * 1024,              # >=4 MiB/step (v7x HBM)
    )

    x3 = x.reshape(n, c, hw)                 # free reshape, no HBM traffic
    g2d = gamma.reshape(c, 1).astype(jnp.float32)
    b2d = beta.reshape(c, 1).astype(jnp.float32)

    grid = (_cdiv(n, nb), _cdiv(hw, tl))     # both independent -> megacore

    out3 = pl.pallas_call(
        functools.partial(_layernorm_kernel, eps=eps, c=c),
        out_shape=jax.ShapeDtypeStruct((n, c, hw), x.dtype),
        grid_spec=pltpu.PrefetchScalarGridSpec(
            num_scalar_prefetch=0,
            grid=grid,
            in_specs=[
                pl.BlockSpec((nb, c, tl), lambda ni, li: (ni, 0, li)),  # x tile
                pl.BlockSpec((c, 1), lambda ni, li: (0, 0)),            # gamma
                pl.BlockSpec((c, 1), lambda ni, li: (0, 0)),            # beta
            ],
            out_specs=pl.BlockSpec((nb, c, tl), lambda ni, li: (ni, 0, li)),
        ),
        compiler_params=pltpu.CompilerParams(
            dimension_semantics=("parallel", "parallel"),
            vmem_limit_bytes=vmem_limit_bytes,
        ),
    )(x3, g2d, b2d)

    return out3.reshape(n, c, h, w)


def layernorm_ref(x, gamma, beta, eps=1e-6):
    """Pure-JAX reference matching the PyTorch module (unbiased std)."""
    mean = jnp.mean(x, axis=1, keepdims=True)
    c = x.shape[1]
    var = jnp.sum((x - mean) ** 2, axis=1, keepdims=True) / (c - 1)
    std = jnp.sqrt(var)
    return gamma * (x - mean) / (std + eps) + beta


if __name__ == "__main__":
    key = jax.random.PRNGKey(0)
    N, C, H, W = 2, 4, 16, 16

    x = jax.random.normal(key, (N, C, H, W), dtype=jnp.float32)
    # Deterministic parameter init matching nn.Parameter(torch.ones / zeros)
    gamma = jnp.ones((1, C, 1, 1), dtype=jnp.float32)
    beta = jnp.zeros((1, C, 1, 1), dtype=jnp.float32)

    out = layernorm_pallas(x, gamma, beta, eps=1e-6)
    out = jax.block_until_ready(out)

    ref = layernorm_ref(x, gamma, beta, eps=1e-6)
    assert out.shape == (N, C, H, W)
    assert jnp.allclose(out, ref, atol=1e-5, rtol=1e-5), "mismatch vs reference"

    print("KERNEL_OK")
</pallas_src>

<mosaic_0001>
module attributes {stable_mosaic.version = 11 : i64} {
  func.func @_layernorm_kernel(%arg0: i32, %arg1: i32, %arg2: memref<1x4x256xf32, #tpu.memory_space<vmem>>, %arg3: memref<4x1xf32, #tpu.memory_space<vmem>>, %arg4: memref<4x1xf32, #tpu.memory_space<vmem>>, %arg5: memref<1x4x256xf32, #tpu.memory_space<vmem>>) attributes {dimension_semantics = [#tpu.dimension_semantics<parallel>, #tpu.dimension_semantics<parallel>], iteration_bounds = array<i64: 2, 1>, scalar_prefetch = 0 : i64, scratch_operands = 0 : i64, tpu.core_type = #tpu.core_type<tc>, window_params = [{transform_indices = @transform_0, window_bounds = array<i64: 1, 4, 256>}, {pipeline_mode = #tpu.pipeline_mode<synchronous>, transform_indices = @transform_1, window_bounds = array<i64: 4, 1>}, {pipeline_mode = #tpu.pipeline_mode<synchronous>, transform_indices = @transform_2, window_bounds = array<i64: 4, 1>}, {transform_indices = @transform_3, window_bounds = array<i64: 1, 4, 256>}]} {
    %c0 = arith.constant 0 : index
    %c0_0 = arith.constant 0 : index
    %c0_1 = arith.constant 0 : index
    %0 = vector.load %arg2[%c0, %c0_0, %c0_1] : memref<1x4x256xf32, #tpu.memory_space<vmem>>, vector<1x4x256xf32>
    %cst = arith.constant dense<0.000000e+00> : vector<1x256xf32>
    %1 = vector.multi_reduction <add>, %0, %cst [1] : vector<1x4x256xf32> to vector<1x256xf32>
    %2 = vector.shape_cast %1 : vector<1x256xf32> to vector<1x1x256xf32>
    %cst_2 = arith.constant 4.000000e+00 : f32
    %3 = vector.broadcast %cst_2 : f32 to vector<1x1x256xf32>
    %4 = arith.divf %2, %3 : vector<1x1x256xf32>
    %5 = vector.broadcast %4 : vector<1x1x256xf32> to vector<1x4x256xf32>
    %6 = arith.subf %0, %5 : vector<1x4x256xf32>
    %7 = arith.mulf %6, %6 : vector<1x4x256xf32>
    %cst_3 = arith.constant dense<0.000000e+00> : vector<1x256xf32>
    %8 = vector.multi_reduction <add>, %7, %cst_3 [1] : vector<1x4x256xf32> to vector<1x256xf32>
    %9 = vector.shape_cast %8 : vector<1x256xf32> to vector<1x1x256xf32>
    %cst_4 = arith.constant 0.333333343 : f32
    %10 = vector.broadcast %cst_4 : f32 to vector<1x1x256xf32>
    %11 = arith.mulf %9, %10 : vector<1x1x256xf32>
    %12 = math.sqrt %11 : vector<1x1x256xf32>
    %cst_5 = arith.constant 9.99999997E-7 : f32
    %13 = vector.broadcast %cst_5 : f32 to vector<1x1x256xf32>
    %14 = arith.addf %12, %13 : vector<1x1x256xf32>
    %15 = tpu.reciprocal %14 : vector<1x1x256xf32> -> vector<1x1x256xf32>
    %c0_6 = arith.constant 0 : index
    %c0_7 = arith.constant 0 : index
    %16 = vector.load %arg3[%c0_6, %c0_7] : memref<4x1xf32, #tpu.memory_space<vmem>>, vector<4x1xf32>
    %c0_8 = arith.constant 0 : index
    %c0_9 = arith.constant 0 : index
    %17 = vector.load %arg4[%c0_8, %c0_9] : memref<4x1xf32, #tpu.memory_space<vmem>>, vector<4x1xf32>
    %18 = vector.broadcast %15 : vector<1x1x256xf32> to vector<1x4x256xf32>
    %19 = arith.mulf %6, %18 : vector<1x4x256xf32>
    %20 = vector.shape_cast %16 : vector<4x1xf32> to vector<1x4x1xf32>
    %21 = vector.broadcast %20 : vector<1x4x1xf32> to vector<1x4x256xf32>
    %22 = arith.mulf %21, %19 : vector<1x4x256xf32>
    %23 = vector.shape_cast %17 : vector<4x1xf32> to vector<1x4x1xf32>
    %24 = vector.broadcast %23 : vector<1x4x1xf32> to vector<1x4x256xf32>
    %25 = arith.addf %22, %24 : vector<1x4x256xf32>
    %c0_10 = arith.constant 0 : index
    %c0_11 = arith.constant 0 : index
    %c0_12 = arith.constant 0 : index
    %26 = vector.load %arg5[%c0_10, %c0_11, %c0_12] : memref<1x4x256xf32, #tpu.memory_space<vmem>>, vector<1x4x256xf32>
    tpu.vector_store %arg5[%c0_10, %c0_11, %c0_12], %25 {strides = array<i32>} : memref<1x4x256xf32, #tpu.memory_space<vmem>>, vector<1x4x256xf32>,
    return
  }
  func.func @transform_0(%arg0: i32, %arg1: i32) -> (i32, i32, i32) {
    %c0_i32 = arith.constant 0 : i32
    %c0_i32_0 = arith.constant 0 : i32
    return %arg0, %c0_i32, %arg1 : i32, i32, i32
  }
  func.func @transform_1(%arg0: i32, %arg1: i32) -> (i32, i32) {
    %c0_i32 = arith.constant 0 : i32
    %c0_i32_0 = arith.constant 0 : i32
    %c0_i32_1 = arith.constant 0 : i32
    return %c0_i32, %c0_i32_0 : i32, i32
  }
  func.func @transform_2(%arg0: i32, %arg1: i32) -> (i32, i32) {
    %c0_i32 = arith.constant 0 : i32
    %c0_i32_0 = arith.constant 0 : i32
    %c0_i32_1 = arith.constant 0 : i32
    return %c0_i32, %c0_i32_0 : i32, i32
  }
  func.func @transform_3(%arg0: i32, %arg1: i32) -> (i32, i32, i32) {
    %c0_i32 = arith.constant 0 : i32
    %c0_i32_0 = arith.constant 0 : i32
    return %arg0, %c0_i32, %arg1 : i32, i32, i32
  }
}

</mosaic_0001>

<bundles_post_ra>
// kernel: tpu_custom_call.1
= control target key start
LH: loop header
LB: loop body
LE: loop exit
PB: predicated region body
PF: predicated region fallthrough
CT: control target
= control target key end

     0   :  { %8 = vsyncpa [#allocation3], 0  ;;  %s830_s0 = inlined_call_operand.hbm [shape: f32[2,4,256], index: 0, kind: input, shape index: {}]   ;;  %s831_s1 = inlined_call_operand.vmem [shape: f32[4,1], index: 1, kind: input, shape index: {}]   ;;  %s832_s2 = inlined_call_operand.vmem [shape: f32[4,1], index: 2, kind: input, shape index: {}]   ;;  %s833_s3 = inlined_call_operand.hbm [shape: f32[2,4,256], index: 3, kind: output, shape index: {}]  }
   0x1   :  { %10 = vsyncpa [#allocation3 + $0x1], 0 }
   0x2   :  { %11 = vsyncpa [#allocation4], 0 }
   0x3   :  { %13 = vsyncpa [#allocation4 + $0x1], 0  ;;  %s688_s12 = smov 0   ;;  %s690_s13 = smov 0  }
   0x4   :  { %s692_s14 = smov 0   ;;  %s694_s15 = smov 0  }
   0x5   :  { %s696_s16 = smov 0   ;;  %s698_s17 = smov 0  }
   0x6 LB: > { %s460_s18 = sadd.s32 4294967295, %s664_s17   ;;  %s461_s19 = sadd.s32 4294967294, %s664_s17   ;;  %s664_s17 = sphi %s698_s17, %s19_s17   ;;  %s660_s16 = sphi %s696_s16, %s842_s16   ;;  %s656_s15 = sphi %s694_s15, %s841_s15   ;;  %s652_s14 = sphi %s692_s14, %s840_s14   ;;  %s648_s13 = sphi %s690_s13, %s839_s13   ;;  %s644_s12 = sphi %s688_s12, %s838_s12  }
   0x7   : > { %s31_s20 = sadd.s32 1, %s660_s16  ;;  %s40_s21 = sadd.s32 1, %s652_s14 }
   0x8   : > { %p33_p0 = scmp.ge.s32.totalorder %s31_s20, 2  ;;  %p47_p1 = scmp.ne.s32.totalorder %s652_s14, %s648_s13 }
   0x9   : > { %p48_p2 = scmp.eq.s32.totalorder %s664_s17, 0  ;;  %p53_p3 = scmp.ne.s32.totalorder %s648_s13, %s644_s12 }
   0xa   : > { %s844_s20 = smov (%p33_p0, %s31_s20), 0  ;;  %p54_p5 = scmp.eq.s32.totalorder %s460_s18, 0 }
   0xb   : > { %p729_p4 = por %p48_p2, %p47_p1  ;;  %s35_s23 = ssub.s32 %s660_s16, %s844_s20 }
   0xc   : > { %p121_p6 = scmp.eq.s32.totalorder %s460_s18, 1  ;;  %p38_p7 = scmp.eq.s32.totalorder %s35_s23, 0 }
   0xd   : > { %p735_p8 = por %p54_p5, %p53_p3  ;;  %p127_p10 = scmp.eq.s32.totalorder %s461_s19, 1 }
   0xe   : > { %p739_p9 = por %p121_p6, %p47_p1  ;;  %p463_p12 = scmp.ge.s32.totalorder %s664_s17, 2 }
   0xf   : > { %s744_s26 = scalar_select %p38_p7, %s652_s14, %s40_s21  }
  0x10   : > { %p746_p11 = por %p127_p10, %p53_p3  ;;  %p489_p13 = scmp.lt.s32.totalorder %s664_s17, 2 }
  0x11   : > { %s153_s28 = sand.u32 1, %s652_s14   ;;  %s475_s30 = sshll.u32 %s660_s16, 3 }
  0x12   : > { %s464_s29 = sshll.u32 %s153_s28, 3  ;;  %s164_s6 = scalar_lea.hbm %s830_s0, %s475_s30 }
  0x13   : > { %s157_s7 = scalar_lea.vmem [#allocation2], %s464_s29  ;;  %s166_s9 = sshll.u32 %s164_s6, 4  ;;  %s167_s9 = int_to_ptr.hbm [resolvable:$true] %s166_s9 }
  0x14   : > { %s168_s8 = sshll.u32 %s157_s7, 4  ;;  %p482_p0 = pnand %p489_p13, %p729_p4  ;;  %s169_s8 = int_to_ptr.vmem [resolvable:$true] %s168_s8 }
  0x15   : > { %p467_p1 = scmp.ge.s32.totalorder %s664_s17, 1  ;;  %p173_p2 = scmp.lt.s32.totalorder %s664_s17, 3 }
  0x16   : > { %s154_s10 = scalar_lea.sflag [#allocation3], %s153_s28 }
  0x17   : > { %484 = dma.hbm_to_vmem [thread:$0]  (!%p482_p0), %s167_s9, 128, %s169_s8, %s154_s10  }
  0x18   : > { %p174_p3 = pnand %p467_p1, %p173_p2 }
  0x19   : > { %s762_s11 = sand.u32 (!%p174_p3), 1, %s648_s13  }
  0x1a   : > { %177 = sbr.rel (%p174_p3) target bundleno = 165 (0xa5), region = 32  ;;  %s468_s18 = sshll.u32 (!%p174_p3), %s762_s11, 3 }
  0x1b   : > { %s180_s19 = scalar_lea.sflag (!%p174_p3), [#allocation3], %s762_s11  ;;  %s183_s21 = scalar_lea.vmem (!%p174_p3), [#allocation2], %s468_s18 }
  0x1f   : > { %635 = dma.done.wait (%p735_p8), %s180_s19, 128  }
  0x20   : > { %637 = vsyncadd (%p735_p8), %s180_s19, 4294967168  ;;  %v666_v0 = vmov 0   ;;  %v667_v1 = vmov 4.0   ;;  %v209_v3 = vld [vmem:[%s183_s21] sm:$0xff]  ;;  %v323_v4 = vld [vmem:[%s831_s1] sm:$0xf] }
  0x21   : > { %541 = vset.pattern.permute.xlu0 %v666_v0  ;;  %542 = vrcp.f32 %v667_v1  ;;  %211 = vst [vmem:[#allocation1] ss:$2 sm:$0xff] %v209_v3  ;;  %v324_v6 = vld [vmem:[%s832_s2] sm:$0xf]  ;;  %vm216_vm0 = vcmask 1043456   ;;  %s476_s24 = sshll.u32 %s656_s15, 3 }
  0x22   : > { %333 = vperm.xlu0 %541, %v323_v4   ;;  %s371_s5 = scalar_lea.hbm %s833_s3, %s476_s24  ;;  %s206_s6 = scalar_lea.vmem [#allocation5], %s468_s18 }
  0x23   : > { %s373_s7 = sshll.u32 %s206_s6, 4  ;;  %s375_s8 = sshll.u32 %s371_s5, 4  ;;  %s374_s7 = int_to_ptr.vmem [resolvable:$true] %s373_s7  ;;  %s376_s8 = int_to_ptr.hbm [resolvable:$true] %s375_s8 }
  0x24   : > { %s358_s15 = scalar_lea.sflag [#allocation4], %s762_s11  ;;  %s596_s9 = sshra.s32 %s376_s8, 4  ;;  %s597_s9 = int_to_ptr.hbm [resolvable:$true] %s596_s9 }
  0x25   : > { %s598_s10 = scalar_lea.hbm %s597_s9, 8  ;;  %s602_s18 = scalar_lea.hbm %s833_s3, 16 }
  0x26   : > { %p599_p4 = scmp.ne.s32.totalorder %s597_s9, %s598_s10  ;;  %p603_p7 = scmp.lt.s32.totalorder %s597_s9, %s833_s3 }
  0x27   : > { %v543_v2 = vpop.eup %542  ;;  %p604_p8 = scmp.lt.s32.totalorder %s602_s18, %s598_s10 }
  0x28   : > { %v232_v5 = vmul.f32 4.0, %v543_v2  ;;  %v212_v8 = vld.sshfl [vmem:[#allocation1] sm:$0xff pattern:$0x75316420]  ;;  %vm236_vm1 = vweird.f32 %v543_v2  ;;  %p600_p5 = pnand %p599_p4, %p739_p9 }
  0x29   : > { %v213_v9 = vld.sshfl [vmem:[#allocation1 + $0x8] sm:$0xff pattern:$0x75316420]  ;;  %v217_v10 = vsel %vm216_vm0, %v212_v8, 0.0  ;;  %p605_p10 = por %p604_p8, %p603_p7 }
  0x2a   : > { %v233_v7 = vsub.f32 1.0, %v232_v5  ;;  %346 = vperm.xlu0 %541, %v324_v6   ;;  %v224_v11 = vsel %vm216_vm0, %v213_v9, 0.0  ;;  %v218_v12 = vrot.slane %v217_v10, 4  ;;  %p601_p6 = pneg %p600_p5 }
  0x2b   : > { %v225_v13 = vrot.slane %v224_v11, 4 }
  0x2c   : > { %v234_v14 = vmul.f32 %v543_v2, %v233_v7  ;;  %v219_v15 = vadd.f32 %v218_v12, %v217_v10  ;;  %p606_p13 = pnand %p605_p10, %p601_p6 }
  0x2d   : > { %v226_v16 = vadd.f32 %v225_v13, %v224_v11 }
  0x2e   : > { %v220_v17 = vrot.slane %v219_v15, 2  ;;  %v235_v19 = vadd.f32 %v543_v2, %v234_v14 }
  0x2f   : > { %v227_v18 = vrot.slane %v226_v16, 2 }
  0x30   : > { %v221_v20 = vadd.f32 %v220_v17, %v219_v15  ;;  %v237_v24 = vsel %vm236_vm1, %v543_v2, %v235_v19 }
  0x31   : > { %v228_v21 = vadd.f32 %v227_v18, %v226_v16 }
  0x32   : > { %v222_v22 = vrot.slane %v221_v20, 1 }
  0x33   : > { %v229_v23 = vrot.slane %v228_v21, 1 }
  0x34   : > { %v223_v25 = vadd.f32 %v222_v22, %v221_v20 }
  0x35   : > { %v230_v26 = vadd.f32 %v229_v23, %v228_v21 }
  0x36   : > { %v238_v27 = vmul.f32 %v237_v24, %v223_v25 }
  0x37   : > { %v239_v28 = vmul.f32 %v237_v24, %v230_v26 }
  0x39   : > { %v242_v29 = vrot.slane %v239_v28, 4 }
  0x3b   : > { %v243_v30 = vsel %vm216_vm0, %v238_v27, %v242_v29 }
  0x3c   : > { %v781_v31 = vsub.f32 %v209_v3, %v243_v30 }
  0x3e   : > { %v246_v32 = vmul.f32 %v781_v31, %v781_v31 }
  0x40   : > { %248 = vst [vmem:[#allocation1] ss:$2 sm:$0xff] %v246_v32 }
  0x47   : > { %v249_v33 = vld.sshfl [vmem:[#allocation1] sm:$0xff pattern:$0x75316420]  ;;  %v250_v34 = vld.sshfl [vmem:[#allocation1 + $0x8] sm:$0xff pattern:$0x75316420] }
  0x48   : > { %v253_v35 = vsel %vm216_vm0, %v249_v33, 0.0  ;;  %v260_v36 = vsel %vm216_vm0, %v250_v34, 0.0 }
  0x49   : > { %v254_v37 = vrot.slane %v253_v35, 4  ;;  %v261_v38 = vrot.slane %v260_v36, 4 }
  0x4b   : > { %v255_v39 = vadd.f32 %v254_v37, %v253_v35  ;;  %v262_v40 = vadd.f32 %v261_v38, %v260_v36 }
  0x4d   : > { %v256_v41 = vrot.slane %v255_v39, 2  ;;  %v263_v42 = vrot.slane %v262_v40, 2 }
  0x4f   : > { %v257_v43 = vadd.f32 %v256_v41, %v255_v39  ;;  %v264_v44 = vadd.f32 %v263_v42, %v262_v40 }
  0x51   : > { %v258_v45 = vrot.slane %v257_v43, 1  ;;  %v265_v46 = vrot.slane %v264_v44, 1 }
  0x53   : > { %v259_v47 = vadd.f32 %v258_v45, %v257_v43  ;;  %v266_v48 = vadd.f32 %v265_v46, %v264_v44 }
  0x55   : > { %v267_v49 = vmul.f32 0.33333334, %v259_v47  ;;  %v268_v50 = vmul.f32 0.33333334, %v266_v48 }
  0x57   : > { %544 = vrsqrt.f32 %v267_v49  ;;  %vm276_vm2 = vcmp.eq.f32.partialorder %v267_v49, inf  ;;  %v279_v62 = vand.u32 2147483648, %v267_v49  ;;  %vm278_vm3 = vcmp.eq.f32.partialorder %v267_v49, 0.0 }
  0x58   : > { %546 = vrsqrt.f32 %v268_v50  ;;  %vm288_vm4 = vcmp.eq.f32.partialorder %v268_v50, inf  ;;  %v291_v1 = vand.u32 2147483648, %v268_v50  ;;  %vm290_vm5 = vcmp.eq.f32.partialorder %v268_v50, 0.0 }
  0x5d   : > { %v545_v51 = vpop.eup %544 }
  0x5e   : > { %v547_v52 = vpop.eup %546  ;;  %v270_v53 = vmul.f32 %v545_v51, %v267_v49 }
  0x5f   : > { %v282_v54 = vmul.f32 %v547_v52, %v268_v50 }
  0x60   : > { %v271_v55 = vmul.f32 %v545_v51, %v270_v53 }
  0x61   : > { %v283_v56 = vmul.f32 %v547_v52, %v282_v54 }
  0x62   : > { %v272_v57 = vmul.f32 0.5, %v271_v55 }
  0x63   : > { %v284_v58 = vmul.f32 0.5, %v283_v56 }
  0x64   : > { %v273_v59 = vsub.f32 1.5, %v272_v57 }
  0x65   : > { %v285_v60 = vsub.f32 1.5, %v284_v58 }
  0x66   : > { %v274_v61 = vmul.f32 %v545_v51, %v273_v59 }
  0x67   : > { %v286_v63 = vmul.f32 %v547_v52, %v285_v60 }
  0x68   : > { %v275_v0 = vmul.f32 %v274_v61, %v267_v49 }
  0x69   : > { %v287_v2 = vmul.f32 %v286_v63, %v268_v50 }
  0x6a   : > { %v277_v3 = vsel %vm276_vm2, %v267_v49, %v275_v0 }
  0x6b   : > { %v280_v4 = vsel %vm278_vm3, %v279_v62, %v277_v3  ;;  %v289_v5 = vsel %vm288_vm4, %v268_v50, %v287_v2 }
  0x6c   : > { %v292_v6 = vsel %vm290_vm5, %v291_v1, %v289_v5  ;;  %v293_v7 = vadd.f32 1e-06, %v280_v4 }
  0x6d   : > { %v294_v8 = vadd.f32 1e-06, %v292_v6 }
  0x6e   : > { %548 = vrcp.f32 %v293_v7  ;;  %vm300_vm6 = vweird.f32 %v293_v7  ;;  %v304_v12 = vand.u32 2147483647, %v293_v7  ;;  %v306_v15 = vand.u32 2147483648, %v293_v7 }
  0x6f   : > { %550 = vrcp.f32 %v294_v8  ;;  %v320_v16 = vand.u32 2147483648, %v294_v8  ;;  %vm314_vm8 = vweird.f32 %v294_v8  ;;  %v318_v18 = vand.u32 2147483647, %v294_v8 }
  0x70   : > { %v307_v22 = vor.u32 1.1754944e-38, %v306_v15  ;;  %vm305_vm12 = vcmp.eq.f32.partialorder %v304_v12, 8.507059e+37 }
  0x71   : > { %v321_v23 = vor.u32 1.1754944e-38, %v320_v16  ;;  %vm319_vm13 = vcmp.eq.f32.partialorder %v318_v18, 8.507059e+37 }
  0x74   : > { %v549_v9 = vpop.eup %548 }
  0x75   : > { %v551_v10 = vpop.eup %550  ;;  %v296_v11 = vmul.f32 %v549_v9, %v293_v7  ;;  %vm301_vm7 = vweird.f32 %v549_v9 }
  0x76   : > { %v310_v13 = vmul.f32 %v551_v10, %v294_v8  ;;  %vm315_vm9 = vweird.f32 %v551_v10  ;;  %vm302_vm10 = vmor %vm300_vm6, %vm301_vm7 }
  0x77   : > { %v297_v14 = vsub.f32 1.0, %v296_v11  ;;  %vm316_vm11 = vmor %vm314_vm8, %vm315_vm9 }
  0x78   : > { %v311_v17 = vsub.f32 1.0, %v310_v13 }
  0x79   : > { %v298_v19 = vmul.f32 %v549_v9, %v297_v14 }
  0x7a   : > { %v312_v20 = vmul.f32 %v551_v10, %v311_v17 }
  0x7b   : > { %v299_v21 = vadd.f32 %v549_v9, %v298_v19 }
  0x7c   : > { %v313_v24 = vadd.f32 %v551_v10, %v312_v20 }
  0x7d   : > { %v303_v25 = vsel %vm302_vm10, %v549_v9, %v299_v21 }
  0x7e   : > { %v317_v26 = vsel %vm316_vm11, %v551_v10, %v313_v24  ;;  %v308_v27 = vsel %vm305_vm12, %v307_v22, %v303_v25 }
  0x7f   : > { %v322_v28 = vsel %vm319_vm13, %v321_v23, %v317_v26 }
  0x80   : > { %v327_v29 = vrot.slane %v322_v28, 4 }
  0x82   : > { %v328_v30 = vsel %vm216_vm0, %v308_v27, %v327_v29 }
  0x83   : > { %v330_v32 = vmul.f32 %v328_v30, %v781_v31 }
  0x85   : > { %337 = vst [vmem:[#allocation1] ss:$2 sm:$0xff] %v330_v32 }
  0x8c   : > { %v339_v34 = vld.sshfl [vmem:[#allocation1 + $0x8] sm:$0xff pattern:$0x75316420]  ;;  %v338_v35 = vld.sshfl [vmem:[#allocation1] sm:$0xff pattern:$0x75316420] }
  0x94   : > { %v334_v33 = vpop.permute.xlu0 %333 }
  0x95   : > { %v343_v36 = vmul.f32 %v339_v34, %v334_v33  ;;  %v342_v38 = vmul.f32 %v338_v35, %v334_v33 }
  0x9c   : > { %v347_v37 = vpop.permute.xlu0 %346 }
  0x9d   : > { %v350_v39 = vadd.f32 %v347_v37, %v343_v36  ;;  %v349_v31 = vadd.f32 %v347_v37, %v342_v38 }
  0x9f   : > { %v353_v40 = vrot.slane %v350_v39, 4 }
  0xa1   : > { %v354_v41 = vsel %vm216_vm0, %v349_v31, %v353_v40 }
  0xa2   : > { %356 = vst [vmem:[%s206_s6] sm:$0xff] %v354_v41 }
  0xa3   : > { %609 = shalt.err (!%p606_p13)
}
  0xa4   : > { %479 = dma.vmem_to_hbm [thread:$0]  (%p739_p9), %s374_s7, 128, %s376_s8, %s358_s15  }
  0xa5 PF: > { %s387_s11 = sand.u32 1, %s644_s12   ;;  %p486_p0 = pnand %p463_p12, %p746_p11 }
  0xa6   : > { %s388_s28 = scalar_lea.sflag [#allocation4], %s387_s11 }
  0xa7   : > { %p487_p1 = pneg %p486_p0 }
  0xa9   : > { %639 = dma.done.wait (%p487_p1), %s388_s28, 128  }
  0xaa   : > { %641 = vsyncadd (%p487_p1), %s388_s28, 4294967168  ;;  %s19_s17 = sadd.s32 1, %s664_s17   ;;  %s838_s12 = smov %s648_s13 }
  0xab   : > { %p16_p2 = scmp.ge.s32.totalorder %s19_s17, 4   ;;  %s839_s13 = smov %s652_s14 }
  0xac   : > { %s840_s14 = smov %s744_s26  ;;  %s841_s15 = smov %s660_s16 }
  0xad   : > { %s842_s16 = smov %s844_s20  ;;  %18 = sbr.rel (!%p16_p2) target bundleno = 6 (0x6), region = 77 }
  0xb2   :  { %394 = vsyncpa [#allocation3], 1 }
  0xb3   :  { %396 = vsyncpa [#allocation3 + $0x1], 1 }
  0xb4   :  { %397 = vsyncpa [#allocation4], 1 }
  0xb5   :  { %399 = vsyncpa [#allocation4 + $0x1], 1 }

</bundles_post_ra>
